<compile_context>
chip_gen: v5e
topology: v5e:2x2
jax: 0.10.0
libtpu: 0.0.40
codegen_flags: <defaults>
</compile_context>

<pallas_src>
import functools

import jax
import jax.numpy as jnp
from jax.experimental import pallas as pl
from jax.experimental.pallas import tpu as pltpu

LANES = 128
TM = 8192                          # rows per grid step on the 128-lane fast path
SMALL_BYTES = 4 * 1024 * 1024      # single-block threshold (bytes per input)
TARGET_BLOCK_BYTES = 2 * 1024 * 1024  # per-input block bytes on the ragged path
VMEM_LIMIT = 32 * 1024 * 1024


# ---------------------------------------------------------------------------
# Kernels
# ---------------------------------------------------------------------------
def _mse_small_kernel(x_ref, t_ref, loss_ref, *, inv_n):
    """Whole slab in one block: single reduce, no accumulator."""
    d = x_ref[...].astype(jnp.float32) - t_ref[...].astype(jnp.float32)
    loss_ref[0, 0] = jnp.sum(d * d) * jnp.float32(inv_n)


def _mse_tiled_kernel(x_ref, t_ref, loss_ref, acc_ref, *,
                      block_rows, total_rows, inv_n, need_mask):
    """Streaming sum of squared differences with a VMEM vector accumulator."""
    i = pl.program_id(0)
    last = pl.num_programs(0) - 1

    @pl.when(i == 0)
    def _():
        acc_ref[...] = jnp.zeros_like(acc_ref)

    def accumulate(mask_rows):
        d = x_ref[...].astype(jnp.float32) - t_ref[...].astype(jnp.float32)
        sq = d * d
        if mask_rows:
            # Rows past the end of the slab are undefined (OOB block) -> zero.
            row_ids = (jax.lax.broadcasted_iota(jnp.int32, (block_rows, 1), 0)
                       + i * block_rows)
            sq = jnp.where(row_ids < total_rows, sq, jnp.float32(0.0))
        if acc_ref.shape[0] == 8 and sq.shape[1] == LANES:
            # Fast path: fold (TM,128) into the (8,128) vreg accumulator —
            # pure VALU adds per step, no cross-lane/sublane work.
            acc_ref[...] += jnp.sum(sq.reshape(block_rows // 8, 8, LANES), axis=0)
        else:
            # Generic last-dim path: reduce the sublane axis into a (1, D) acc.
            acc_ref[...] += jnp.sum(sq, axis=0, keepdims=True)

    if need_mask:
        # Mask only on the LAST grid step; all other steps take the cheap path.
        @pl.when(i != last)
        def _():
            accumulate(False)

        @pl.when(i == last)
        def _():
            accumulate(True)
    else:
        accumulate(False)

    @pl.when(i == last)
    def _():
        # Single cross-lane reduce + scale in the epilogue only.
        loss_ref[0, 0] = jnp.sum(acc_ref[...]) * jnp.float32(inv_n)


# ---------------------------------------------------------------------------
# pallas_call wrappers
# ---------------------------------------------------------------------------
def _cost(x, t):
    n = x.size
    return pl.CostEstimate(
        flops=3 * n, transcendentals=0,
        bytes_accessed=n * x.dtype.itemsize + n * t.dtype.itemsize + 4)


def _small_call(x2d, t2d, inv_n, cost):
    r, d = x2d.shape
    return pl.pallas_call(
        functools.partial(_mse_small_kernel, inv_n=inv_n),
        out_shape=jax.ShapeDtypeStruct((1, 1), jnp.float32),
        grid_spec=pltpu.PrefetchScalarGridSpec(
            num_scalar_prefetch=0,
            grid=(1,),
            in_specs=[pl.BlockSpec((r, d), lambda i: (0, 0)),
                      pl.BlockSpec((r, d), lambda i: (0, 0))],
            out_specs=pl.BlockSpec((1, 1), lambda i: (0, 0),
                                   memory_space=pltpu.SMEM),
        ),
        compiler_params=pltpu.CompilerParams(
            dimension_semantics=("arbitrary",), vmem_limit_bytes=VMEM_LIMIT),
        cost_estimate=cost,
    )(x2d, t2d)


def _tiled_call(x2d, t2d, inv_n, block_rows, acc_shape, cost):
    rows, d = x2d.shape
    n_tiles = pl.cdiv(rows, block_rows)
    need_mask = (rows % block_rows) != 0
    kernel = functools.partial(
        _mse_tiled_kernel, block_rows=block_rows, total_rows=rows,
        inv_n=inv_n, need_mask=need_mask)
    return pl.pallas_call(
        kernel,
        out_shape=jax.ShapeDtypeStruct((1, 1), jnp.float32),
        grid_spec=pltpu.PrefetchScalarGridSpec(
            num_scalar_prefetch=0,
            grid=(n_tiles,),
            in_specs=[pl.BlockSpec((block_rows, d), lambda i: (i, 0)),
                      pl.BlockSpec((block_rows, d), lambda i: (i, 0))],
            out_specs=pl.BlockSpec((1, 1), lambda i: (0, 0),
                                   memory_space=pltpu.SMEM),
            scratch_shapes=[pltpu.VMEM(acc_shape, jnp.float32)],
        ),
        compiler_params=pltpu.CompilerParams(
            dimension_semantics=("arbitrary",), vmem_limit_bytes=VMEM_LIMIT),
        cost_estimate=cost,
    )(x2d, t2d)


def _dispatch_lanes(x2d, t2d, inv_n, cost):
    """(rows, 128) slab: single block if small, else TM-row streaming tiles."""
    rows = x2d.shape[0]
    if rows <= TM:
        return _small_call(x2d, t2d, inv_n, cost)
    return _tiled_call(x2d, t2d, inv_n, TM, (8, LANES), cost)


def content_loss(x, target):
    """Returns (x, loss) where loss = mean((x - target)**2) over all elems."""
    assert x.shape == target.shape, "input/target shape mismatch"
    total = x.size
    inv_n = 1.0 / float(max(total, 1))
    cost = _cost(x, target)

    if total % LANES == 0:
        # Fast path: dense 128-lane slab (typical conv feature maps).
        rows = total // LANES
        loss = _dispatch_lanes(x.reshape(rows, LANES),
                               target.reshape(rows, LANES), inv_n, cost)
    else:
        # Ragged element count: free contiguous collapse to 2-D with the last
        # dim at full extent -> no jnp.pad, no extra HBM pass over the inputs.
        d = x.shape[-1] if x.ndim >= 1 else 1
        d = max(d, 1)
        r = total // d
        x2d = x.reshape(r, d)
        t2d = target.reshape(r, d)
        in_bytes = total * x2d.dtype.itemsize
        if in_bytes <= SMALL_BYTES:
            loss = _small_call(x2d, t2d, inv_n, cost)
        else:
            block_rows = (TARGET_BLOCK_BYTES // (d * x2d.dtype.itemsize)) // 8 * 8
            if block_rows >= 8:
                loss = _tiled_call(x2d, t2d, inv_n, block_rows, (1, d), cost)
            else:
                # TODO(synk): pathological last dim (> ~64K lanes) — fall back
                # to lane padding + the 128-lane path (one extra HBM copy).
                pad = (-total) % LANES
                xf = jnp.pad(x.reshape(-1), (0, pad))
                tf = jnp.pad(target.reshape(-1), (0, pad))
                rows = xf.size // LANES
                loss = _dispatch_lanes(xf.reshape(rows, LANES),
                                       tf.reshape(rows, LANES), inv_n, cost)

    # Module forward returns the input unchanged; loss is the side product.
    return x, loss[0, 0]


# ---------------------------------------------------------------------------
# Self-test
# ---------------------------------------------------------------------------
def _check(shape, key, dtype=jnp.float32):
    kx, kt = jax.random.split(key)
    x = jax.random.normal(kx, shape, dtype=dtype)
    t = jax.random.normal(kt, shape, dtype=dtype)
    out, loss = content_loss(x, t)
    out = jax.block_until_ready(out)
    loss = jax.block_until_ready(loss)
    ref = jnp.mean((x.astype(jnp.float32) - t.astype(jnp.float32)) ** 2)
    assert jnp.allclose(loss, ref, rtol=1e-5, atol=1e-6), (shape, loss, ref)
    assert jnp.array_equal(out, x)


if __name__ == "__main__":
    key = jax.random.PRNGKey(0)

    # Primary example: small NCHW conv-feature-like tensor (single-block path).
    key, k0 = jax.random.split(key)
    _check((2, 4, 16, 16), k0)

    # Tiled fast path, rows an exact multiple of TM (2 tiles of 8192 rows).
    key, k1 = jax.random.split(key)
    _check((2, 16, 256, 256), k1)

    # Tiled fast path with a partial last row-tile (mask only on last step).
    key, k2 = jax.random.split(key)
    _check((2, 16, 192, 192), k2)

    # Ragged element count, small -> single block on the (850, 170) collapse.
    key, k3 = jax.random.split(key)
    _check((1, 5, 170, 170), k3)

    # Ragged element count, large -> generic row-tiled path, no jnp.pad copy.
    key, k4 = jax.random.split(key)
    _check((1, 9, 350, 351), k4)

    # bf16 inputs accepted directly (halves HBM bytes); math stays f32.
    key, k5 = jax.random.split(key)
    _check((2, 4, 16, 16), k5, dtype=jnp.bfloat16)

    print("KERNEL_OK")
</pallas_src>

<mosaic_0001>
module attributes {stable_mosaic.version = 11 : i64} {
  func.func @_mse_small_kernel(%arg0: i32, %arg1: memref<16x128xf32, #tpu.memory_space<vmem>>, %arg2: memref<16x128xf32, #tpu.memory_space<vmem>>, %arg3: memref<1x1xf32, #tpu.memory_space<smem>>) attributes {dimension_semantics = [#tpu.dimension_semantics<arbitrary>], iteration_bounds = array<i64: 1>, scalar_prefetch = 0 : i64, scratch_operands = 0 : i64, tpu.core_type = #tpu.core_type<tc>, window_params = [{pipeline_mode = #tpu.pipeline_mode<synchronous>, transform_indices = @transform_0, window_bounds = array<i64: 16, 128>}, {pipeline_mode = #tpu.pipeline_mode<synchronous>, transform_indices = @transform_1, window_bounds = array<i64: 16, 128>}, {transform_indices = @transform_2, window_bounds = array<i64: 1, 1>}]} {
    %c0 = arith.constant 0 : index
    %c0_0 = arith.constant 0 : index
    %0 = vector.load %arg1[%c0, %c0_0] : memref<16x128xf32, #tpu.memory_space<vmem>>, vector<16x128xf32>
    %c0_1 = arith.constant 0 : index
    %c0_2 = arith.constant 0 : index
    %1 = vector.load %arg2[%c0_1, %c0_2] : memref<16x128xf32, #tpu.memory_space<vmem>>, vector<16x128xf32>
    %2 = arith.subf %0, %1 : vector<16x128xf32>
    %3 = arith.mulf %2, %2 : vector<16x128xf32>
    %4 = vector.shape_cast %3 : vector<16x128xf32> to vector<1x16x128xf32>
    %cst = arith.constant dense<0.000000e+00> : vector<1xf32>
    %5 = vector.multi_reduction <add>, %4, %cst [1, 2] : vector<1x16x128xf32> to vector<1xf32>
    %6 = vector.shape_cast %5 : vector<1xf32> to vector<1x1x1xf32>
    %7 = vector.extract %6[0, 0, 0] : f32 from vector<1x1x1xf32>
    %cst_3 = arith.constant 4.8828125E-4 : f32
    %8 = arith.mulf %7, %cst_3 : f32
    %c0_4 = arith.constant 0 : index
    %c0_5 = arith.constant 0 : index
    %9 = memref.load %arg3[%c0_4, %c0_5] : memref<1x1xf32, #tpu.memory_space<smem>>
    memref.store %8, %arg3[%c0_4, %c0_5] : memref<1x1xf32, #tpu.memory_space<smem>>
    return
  }
  func.func @transform_0(%arg0: i32) -> (i32, i32) {
    %c0_i32 = arith.constant 0 : i32
    %c0_i32_0 = arith.constant 0 : i32
    %c0_i32_1 = arith.constant 0 : i32
    return %c0_i32, %c0_i32_0 : i32, i32
  }
  func.func @transform_1(%arg0: i32) -> (i32, i32) {
    %c0_i32 = arith.constant 0 : i32
    %c0_i32_0 = arith.constant 0 : i32
    %c0_i32_1 = arith.constant 0 : i32
    return %c0_i32, %c0_i32_0 : i32, i32
  }
  func.func @transform_2(%arg0: i32) -> (i32, i32) {
    %c0_i32 = arith.constant 0 : i32
    %c0_i32_0 = arith.constant 0 : i32
    %c0_i32_1 = arith.constant 0 : i32
    return %c0_i32, %c0_i32_0 : i32, i32
  }
}

</mosaic_0001>

<bundles_post_ra>
// kernel: tpu_custom_call.1
= control target key start
LH: loop header
LB: loop body
LE: loop exit
PB: predicated region body
PF: predicated region fallthrough
CT: control target
= control target key end

     0   :  { %7 = vsyncpa [#allocation3], 0  ;;  %s184_s0 = inlined_call_operand.hbm [shape: f32[16,128], index: 0, kind: input, shape index: {}]   ;;  %s185_s1 = inlined_call_operand.hbm [shape: f32[16,128], index: 1, kind: input, shape index: {}]   ;;  %s186_s2 = inlined_call_operand.hbm [shape: f32[1,1], index: 2, kind: output, shape index: {}]  }
   0x1   :  { %8 = vsyncpa [#allocation6], 0 }
   0x2   :  { %9 = vsyncpa [#allocation4], 0  ;;  %s14_s11 = sshll.u32 %s184_s0, 4  ;;  %s155_s12 = smov [#allocation2]   ;;  %s15_s11 = int_to_ptr.hbm [resolvable:$true] %s14_s11 }
   0x3   :  { %s16_s13 = sshll.u32 %s155_s12, 4  ;;  %s27_s16 = sshll.u32 %s185_s1, 4  ;;  %s17_s13 = int_to_ptr.vmem [resolvable:$true] %s16_s13  ;;  %s28_s16 = int_to_ptr.hbm [resolvable:$true] %s27_s16 }
   0x4   :  { %s156_s17 = smov 128   ;;  %s157_s18 = smov 8  }
   0x5   :  { %22 = dma.hbm_to_vmem [thread:$0]  %s15_s11, 256, %s17_s13, [#allocation3], %s156_s17, %s156_s17, %s157_s18  }
   0x6   :  { %s158_s19 = smov [#allocation5]  }
   0x7   :  { %s29_s20 = sshll.u32 %s158_s19, 4  ;;  %s30_s20 = int_to_ptr.vmem [resolvable:$true] %s29_s20 }
   0x8   :  { %35 = dma.hbm_to_vmem [thread:$0]  %s28_s16, 256, %s30_s20, [#allocation6], %s156_s17, %s156_s17, %s157_s18  }
   0x9   :  { %149 = dma.done.wait [#allocation3], 256  }
   0xa   :  { %150 = vsyncadd [#allocation3], 4294967040 }
   0xb   :  { %151 = dma.done.wait [#allocation6], 256  }
   0xc   :  { %152 = vsyncadd [#allocation6], 4294967040  ;;  %v44_v0 = vld [vmem:[#allocation2] sm:$0xff]  ;;  %v45_v1 = vld [vmem:[#allocation2 + $0x8] sm:$0xff]  ;;  %s70_s21 = sshll.u32 %s186_s2, 4  ;;  %s159_s24 = smov [#allocation7]   ;;  %s71_s21 = int_to_ptr.hbm [resolvable:$true] %s70_s21 }
   0xd   :  { %v46_v2 = vld [vmem:[#allocation5] sm:$0xff]  ;;  %v47_v3 = vld [vmem:[#allocation5 + $0x8] sm:$0xff] }
   0xe   :  { %v48_v4 = vsub.f32 %v44_v0, %v46_v2  ;;  %v49_v5 = vsub.f32 %v45_v1, %v47_v3 }
  0x10   :  { %v50_v6 = vmul.f32 %v48_v4, %v48_v4  ;;  %v51_v7 = vmul.f32 %v49_v5, %v49_v5 }
  0x12   :  { %v52_v8 = vadd.f32 %v51_v7, %v50_v6 }
  0x14   :  { %53 = vadd.xlane.f32.xlu0 %v52_v8 }
  0x87   :  { %v54_v9 = vpop.xlane.xlu0 %53 }
  0x88   :  { %v55_v10 = vrot.slane %v54_v9, 4 }
  0x8a   :  { %v56_v11 = vadd.f32 %v55_v10, %v54_v9 }
  0x8c   :  { %v57_v12 = vrot.slane %v56_v11, 2 }
  0x8e   :  { %v58_v13 = vadd.f32 %v57_v12, %v56_v11 }
  0x90   :  { %v59_v14 = vrot.slane %v58_v13, 1 }
  0x92   :  { %v60_v15 = vadd.f32 %v59_v14, %v58_v13 }
  0x94   :  { %82 = vpush %v60_v15 }
  0xc5   :  { %s83_s22 = spop %82 }
  0xc6   :  { %s62_s23 = smul.f32 0.00048828125, %s83_s22 }
  0xc8   :  { %64 = sst [smem:[#allocation7]] %s62_s23 }
  0xc9   :  { %73 = dma.smem_to_hbm %s159_s24, 16, %s71_s21, [#allocation4]  }
  0xca   :  { %153 = dma.done.wait [#allocation4], 16  }
  0xcb   :  { %154 = vsyncadd [#allocation4], 4294967280 }
  0xcc   :  { %78 = sfence }
  0xcd   :  { %79 = vsyncpa [#allocation3], 1 }
  0xce   :  { %80 = vsyncpa [#allocation6], 1 }
  0xcf   :  { %81 = vsyncpa [#allocation4], 1 }

</bundles_post_ra>
